<compile_context>
chip_gen: v5e
topology: v5e:2x2
jax: 0.10.0
libtpu: 0.0.40
codegen_flags: <defaults>
</compile_context>

<pallas_src>
import functools
import math

import jax
import jax.numpy as jnp
from jax.experimental import pallas as pl
from jax.experimental.pallas import tpu as pltpu


def _round_up(x, m):
    return ((x + m - 1) // m) * m


# --------------------- kernel 1: reciprocal column norms of w ---------------------
def _winv_kernel(w_ref, winv_ref, acc_ref):
    @pl.when(pl.program_id(1) == 0)
    def _():
        acc_ref[...] = jnp.zeros_like(acc_ref)

    w = w_ref[...].astype(jnp.float32)
    acc_ref[...] += jnp.sum(w * w, axis=0, keepdims=True)

    @pl.when(pl.program_id(1) == pl.num_programs(1) - 1)
    def _():
        nrm = jnp.sqrt(acc_ref[...])
        winv_ref[...] = jnp.where(nrm > 0.0, 1.0 / nrm, 0.0)


# --------------------- kernel 2: row norms of x ---------------------
def _xlen_kernel(x_ref, xlen_ref, acc_ref):
    @pl.when(pl.program_id(1) == 0)
    def _():
        acc_ref[...] = jnp.zeros_like(acc_ref)

    x = x_ref[...].astype(jnp.float32)
    acc_ref[...] += jnp.sum(x * x, axis=1, keepdims=True)

    @pl.when(pl.program_id(1) == pl.num_programs(1) - 1)
    def _():
        xlen_ref[...] = jnp.sqrt(acc_ref[...])


# --------------------- kernel 3: fused matmul + angular transform ---------------------
def _angle_kernel(x_ref, w_ref, xlen_ref, winv_ref, cos_ref, phi_ref, acc_ref,
                  *, m, cos_thresholds):
    k_step = pl.program_id(2)

    @pl.when(k_step == 0)
    def _():
        acc_ref[...] = jnp.zeros_like(acc_ref)

    acc_ref[...] += jnp.dot(x_ref[...].astype(jnp.float32),
                            w_ref[...].astype(jnp.float32),
                            preferred_element_type=jnp.float32)

    @pl.when(k_step == pl.num_programs(2) - 1)
    def _():
        xlen = xlen_ref[...]                                   # (TN, 1)
        winv = winv_ref[...]                                   # (1, TC)
        xinv = jnp.where(xlen > 0.0, 1.0 / xlen, 0.0)

        c = jnp.clip(acc_ref[...] * xinv * winv, -1.0, 1.0)    # normalized cos(theta)

        # cos(m*theta) via Chebyshev polynomial T_m(c)  (m is static)
        if m == 0:
            cos_m = jnp.ones_like(c)
        elif m == 1:
            cos_m = c
        elif m == 2:
            cos_m = 2.0 * c * c - 1.0
        elif m == 3:
            cos_m = (4.0 * c * c - 3.0) * c
        elif m == 4:
            c2 = c * c
            cos_m = 8.0 * c2 * (c2 - 1.0) + 1.0
        else:  # m == 5
            c2 = c * c
            cos_m = ((16.0 * c2 - 20.0) * c2 + 5.0) * c

        # k = floor(m*theta/pi) = #{ j in 1..m : cos(theta) <= cos(j*pi/m) }
        k_int = jnp.zeros(c.shape, jnp.int32)
        for thr in cos_thresholds:                             # static unroll (<= 5)
            k_int = k_int + (c <= thr).astype(jnp.int32)
        k_f = k_int.astype(jnp.float32)
        sign = jnp.where((k_int % 2) == 0, 1.0, -1.0)
        phi = sign * cos_m - 2.0 * k_f

        cos_ref[...] = (c * xlen).astype(cos_ref.dtype)
        phi_ref[...] = (phi * xlen).astype(phi_ref.dtype)


# --------------------- wrapper ---------------------
def angle_linear(x, w, m=2):
    """Forward pass of AngleLinear (phiflag=False path). Returns (cos_theta, phi_theta, xlen)."""
    assert 0 <= m <= 5
    n, d = x.shape
    d2, c = w.shape
    assert d == d2
    out_dtype = x.dtype

    # Lane-dense tiles, sized well under the scoped-VMEM defaults of v5e/v6e/v7x
    # (x: 256x512x4=512KiB, w: 512x512x4=1MiB, acc+2 outs: 1.5MiB -> < 6MiB with
    #  double buffering), so no vmem_limit override is required on any generation.
    tile_n = min(256, _round_up(n, 8))
    tile_c = min(512, _round_up(c, 128))
    tile_k = min(512, _round_up(d, 128))

    n_p = _round_up(n, tile_n)
    c_p = _round_up(c, tile_c)
    d_p = _round_up(d, tile_k)

    # Zero padding is benign: it adds 0 to every dot product / norm, and fully
    # padded rows/columns produce finite zeros that are sliced off below.
    xp = jnp.pad(x.astype(jnp.float32), ((0, n_p - n), (0, d_p - d)))
    wp = jnp.pad(w.astype(jnp.float32), ((0, d_p - d), (0, c_p - c)))

    gn, gc, gk = n_p // tile_n, c_p // tile_c, d_p // tile_k

    # --- per-column 1/||w_j|| (renorm scale cancels analytically) ---
    winv = pl.pallas_call(
        _winv_kernel,
        out_shape=jax.ShapeDtypeStruct((1, c_p), jnp.float32),
        grid=(gc, gk),
        in_specs=[pl.BlockSpec((tile_k, tile_c), lambda j, k: (k, j))],
        out_specs=pl.BlockSpec((1, tile_c), lambda j, k: (0, j)),
        scratch_shapes=[pltpu.VMEM((1, tile_c), jnp.float32)],
        compiler_params=pltpu.CompilerParams(
            dimension_semantics=("parallel", "arbitrary")),
    )(wp)

    # --- per-row ||x_i|| ---
    xlen2d = pl.pallas_call(
        _xlen_kernel,
        out_shape=jax.ShapeDtypeStruct((n_p, 1), jnp.float32),
        grid=(gn, gk),
        in_specs=[pl.BlockSpec((tile_n, tile_k), lambda i, k: (i, k))],
        out_specs=pl.BlockSpec((tile_n, 1), lambda i, k: (i, 0)),
        scratch_shapes=[pltpu.VMEM((tile_n, 1), jnp.float32)],
        compiler_params=pltpu.CompilerParams(
            dimension_semantics=("parallel", "arbitrary")),
    )(xp)

    # --- main fused matmul + angular margin kernel ---
    thresholds = tuple(math.cos(j * math.pi / m) for j in range(1, m + 1)) if m > 0 else ()
    kern = functools.partial(_angle_kernel, m=m, cos_thresholds=thresholds)

    cost = pl.CostEstimate(
        flops=int(2 * n_p * c_p * d_p + 12 * n_p * c_p),
        transcendentals=0,
        bytes_accessed=int(4 * (n_p * d_p * gc + d_p * c_p * gn + 2 * n_p * c_p)),
    )

    cos_t, phi_t = pl.pallas_call(
        kern,
        out_shape=(jax.ShapeDtypeStruct((n_p, c_p), jnp.float32),
                   jax.ShapeDtypeStruct((n_p, c_p), jnp.float32)),
        grid=(gn, gc, gk),
        in_specs=[
            pl.BlockSpec((tile_n, tile_k), lambda i, j, k: (i, k)),
            pl.BlockSpec((tile_k, tile_c), lambda i, j, k: (k, j)),
            pl.BlockSpec((tile_n, 1), lambda i, j, k: (i, 0)),
            pl.BlockSpec((1, tile_c), lambda i, j, k: (0, j)),
        ],
        out_specs=(
            pl.BlockSpec((tile_n, tile_c), lambda i, j, k: (i, j)),
            pl.BlockSpec((tile_n, tile_c), lambda i, j, k: (i, j)),
        ),
        scratch_shapes=[pltpu.VMEM((tile_n, tile_c), jnp.float32)],
        compiler_params=pltpu.CompilerParams(
            dimension_semantics=("parallel", "parallel", "arbitrary")),
        cost_estimate=cost,
    )(xp, wp, xlen2d, winv)

    return (cos_t[:n, :c].astype(out_dtype),
            phi_t[:n, :c].astype(out_dtype),
            xlen2d[:n, 0].astype(out_dtype))


# --------------------- reference (faithful port of the torch forward) ---------------------
def angle_linear_ref(x, w, m=2):
    wnorm = jnp.sqrt(jnp.sum(w * w, axis=0))
    scale = jnp.where(wnorm > 1e-5, 1e-5 / (wnorm + 1e-7), 1.0)
    ww = w * scale[None, :] * 1e5
    xlen = jnp.sqrt(jnp.sum(x * x, axis=1))
    wlen = jnp.sqrt(jnp.sum(ww * ww, axis=0))
    cos_theta = jnp.matmul(x, ww, precision=jax.lax.Precision.HIGHEST)
    cos_theta = cos_theta / xlen[:, None] / wlen[None, :]
    cos_theta = jnp.clip(cos_theta, -1.0, 1.0)
    theta = jnp.arccos(cos_theta)
    cos_m_theta = jnp.cos(m * theta)
    k = jnp.floor(m * theta / math.pi)
    sign = jnp.where(jnp.mod(k, 2.0) == 0.0, 1.0, -1.0)   # (-1)**k for integer-valued k
    phi_theta = sign * cos_m_theta - 2.0 * k
    return cos_theta * xlen[:, None], phi_theta * xlen[:, None], xlen


if __name__ == "__main__":
    # AngleLinear(in_features=32, out_features=64, m=2, phiflag=False)
    # TODO(synk): phiflag=True branch differs only by torch's truncated pi constant; not reproduced.
    in_features, out_features, batch, m = 32, 64, 8, 2

    key = jax.random.PRNGKey(0)
    kx, kw = jax.random.split(key)
    x = jax.random.normal(kx, (batch, in_features), dtype=jnp.float32)
    w = jax.random.uniform(kw, (in_features, out_features),
                           minval=-1.0, maxval=1.0, dtype=jnp.float32)

    cos_t, phi_t, xlen = angle_linear(x, w, m=m)
    jax.block_until_ready((cos_t, phi_t, xlen))

    cos_ref, phi_ref, xlen_ref = angle_linear_ref(x, w, m=m)
    assert cos_t.shape == (batch, out_features)
    assert phi_t.shape == (batch, out_features)
    assert xlen.shape == (batch,)
    assert jnp.allclose(cos_t, cos_ref, atol=1e-3, rtol=1e-3), "cos_theta mismatch"
    assert jnp.allclose(phi_t, phi_ref, atol=1e-3, rtol=1e-3), "phi_theta mismatch"
    assert jnp.allclose(xlen, xlen_ref, atol=1e-4, rtol=1e-4), "xlen mismatch"

    print("KERNEL_OK")
</pallas_src>

<mosaic_0001>
module attributes {stable_mosaic.version = 11 : i64} {
  func.func @_winv_kernel(%arg0: i32, %arg1: i32, %arg2: memref<128x128xf32, #tpu.memory_space<vmem>>, %arg3: memref<1x128xf32, #tpu.memory_space<vmem>>, %arg4: memref<1x128xf32, #tpu.memory_space<vmem>>) attributes {dimension_semantics = [#tpu.dimension_semantics<parallel>, #tpu.dimension_semantics<arbitrary>], iteration_bounds = array<i64: 1, 1>, scalar_prefetch = 0 : i64, scratch_operands = 1 : i64, tpu.core_type = #tpu.core_type<tc>, window_params = [{transform_indices = @transform_0, window_bounds = array<i64: 128, 128>}, {transform_indices = @transform_1, window_bounds = array<i64: 1, 128>}]} {
    %c0_i32 = arith.constant 0 : i32
    %0 = arith.cmpi eq, %arg1, %c0_i32 : i32
    %1 = arith.extui %0 : i1 to i32
    %c0_i32_0 = arith.constant 0 : i32
    %2 = arith.cmpi ne, %1, %c0_i32_0 : i32
    scf.if %2 {
      %cst_8 = arith.constant 0.000000e+00 : f32
      %13 = vector.broadcast %cst_8 : f32 to vector<1x128xf32>
      %c0_9 = arith.constant 0 : index
      %c0_10 = arith.constant 0 : index
      %14 = vector.load %arg4[%c0_9, %c0_10] : memref<1x128xf32, #tpu.memory_space<vmem>>, vector<1x128xf32>
      tpu.vector_store %arg4[%c0_9, %c0_10], %13 {strides = array<i32>} : memref<1x128xf32, #tpu.memory_space<vmem>>, vector<1x128xf32>,
    } else {
    }
    %c0 = arith.constant 0 : index
    %c0_1 = arith.constant 0 : index
    %3 = vector.load %arg2[%c0, %c0_1] : memref<128x128xf32, #tpu.memory_space<vmem>>, vector<128x128xf32>
    %c0_2 = arith.constant 0 : index
    %c0_3 = arith.constant 0 : index
    %4 = vector.load %arg4[%c0_2, %c0_3] : memref<1x128xf32, #tpu.memory_space<vmem>>, vector<1x128xf32>
    %5 = arith.mulf %3, %3 : vector<128x128xf32>
    %cst = arith.constant dense<0.000000e+00> : vector<128xf32>
    %6 = vector.multi_reduction <add>, %5, %cst [0] : vector<128x128xf32> to vector<128xf32>
    %7 = vector.shape_cast %6 : vector<128xf32> to vector<1x128xf32>
    %8 = arith.addf %4, %7 : vector<1x128xf32>
    %c0_4 = arith.constant 0 : index
    %c0_5 = arith.constant 0 : index
    %9 = vector.load %arg4[%c0_4, %c0_5] : memref<1x128xf32, #tpu.memory_space<vmem>>, vector<1x128xf32>
    tpu.vector_store %arg4[%c0_4, %c0_5], %8 {strides = array<i32>} : memref<1x128xf32, #tpu.memory_space<vmem>>, vector<1x128xf32>,
    %c0_i32_6 = arith.constant 0 : i32
    %10 = arith.cmpi eq, %arg1, %c0_i32_6 : i32
    %11 = arith.extui %10 : i1 to i32
    %c0_i32_7 = arith.constant 0 : i32
    %12 = arith.cmpi ne, %11, %c0_i32_7 : i32
    scf.if %12 {
      %c0_8 = arith.constant 0 : index
      %c0_9 = arith.constant 0 : index
      %13 = vector.load %arg4[%c0_8, %c0_9] : memref<1x128xf32, #tpu.memory_space<vmem>>, vector<1x128xf32>
      %14 = math.sqrt %13 : vector<1x128xf32>
      %cst_10 = arith.constant 0.000000e+00 : f32
      %15 = vector.broadcast %cst_10 : f32 to vector<1x128xf32>
      %16 = arith.cmpf ogt, %14, %15 : vector<1x128xf32>
      %cst_11 = arith.constant 1.000000e+00 : f32
      %17 = vector.broadcast %cst_11 : f32 to vector<1x128xf32>
      %18 = arith.divf %17, %14 : vector<1x128xf32>
      %cst_12 = arith.constant 0.000000e+00 : f32
      %19 = vector.broadcast %cst_12 : f32 to vector<1x128xf32>
      %20 = arith.select %16, %18, %19 : vector<1x128xi1>, vector<1x128xf32>
      %c0_13 = arith.constant 0 : index
      %c0_14 = arith.constant 0 : index
      %21 = vector.load %arg3[%c0_13, %c0_14] : memref<1x128xf32, #tpu.memory_space<vmem>>, vector<1x128xf32>
      tpu.vector_store %arg3[%c0_13, %c0_14], %20 {strides = array<i32>} : memref<1x128xf32, #tpu.memory_space<vmem>>, vector<1x128xf32>,
    } else {
    }
    return
  }
  func.func @transform_0(%arg0: i32, %arg1: i32) -> (i32, i32) {
    %c0_i32 = arith.constant 0 : i32
    return %arg1, %arg0 : i32, i32
  }
  func.func @transform_1(%arg0: i32, %arg1: i32) -> (i32, i32) {
    %c0_i32 = arith.constant 0 : i32
    %c0_i32_0 = arith.constant 0 : i32
    return %c0_i32, %arg0 : i32, i32
  }
}

</mosaic_0001>

<bundles_post_ra>
// kernel: tpu_custom_call.1
= control target key start
LH: loop header
LB: loop body
LE: loop exit
PB: predicated region body
PF: predicated region fallthrough
CT: control target
= control target key end

     0   :  { %6 = vsyncpa [#allocation4], 0  ;;  %s219_s0 = inlined_call_operand.hbm [shape: f32[128,128], index: 0, kind: input, shape index: {}]   ;;  %s220_s1 = inlined_call_operand.hbm [shape: f32[1,128], index: 1, kind: output, shape index: {}]  }
   0x1   :  { %7 = vsyncpa [#allocation5], 0  ;;  %s12_s8 = sshll.u32 %s219_s0, 4  ;;  %s198_s9 = smov [#allocation3]   ;;  %s13_s8 = int_to_ptr.hbm [resolvable:$true] %s12_s8 }
   0x2   :  { %s14_s10 = sshll.u32 %s198_s9, 4  ;;  %s199_s11 = smov 128   ;;  %s15_s10 = int_to_ptr.vmem [resolvable:$true] %s14_s10 }
   0x3   :  { %s200_s12 = smov 8  }
   0x4   :  { %20 = dma.hbm_to_vmem [thread:$0]  %s13_s8, 2048, %s15_s10, [#allocation4], %s199_s11, %s199_s11, %s200_s12  }
   0x5   :  { %194 = dma.done.wait [#allocation4], 2048  }
   0x6   :  { %195 = vsyncadd [#allocation4], 4294965248  ;;  %v201_v0 = vmov 0.0   ;;  %v30_v1 = vld [vmem:[#allocation3] sm:$0xff]  ;;  %v31_v2 = vld [vmem:[#allocation3 + $0x8] sm:$0xff]  ;;  %s202_s0 = smov [#allocation6]  }
   0x7   :  { %29 = vst [vmem:[#allocation2] sm:$0x1] %v201_v0  ;;  %v32_v3 = vld [vmem:[#allocation3 + $0x10] sm:$0xff]  ;;  %v33_v4 = vld [vmem:[#allocation3 + $0x18] sm:$0xff]  ;;  %v47_v5 = vmul.f32 %v30_v1, %v30_v1  ;;  %v48_v6 = vmul.f32 %v31_v2, %v31_v2  ;;  %v34_v8 = vld [vmem:[#allocation3 + $0x20] sm:$0xff]  ;;  %s125_s13 = sshll.u32 %s202_s0, 4  ;;  %s126_s13 = int_to_ptr.vmem [resolvable:$true] %s125_s13 }
   0x8   :  { %v49_v7 = vmul.f32 %v32_v3, %v32_v3  ;;  %v50_v9 = vmul.f32 %v33_v4, %v33_v4  ;;  %v35_v11 = vld [vmem:[#allocation3 + $0x28] sm:$0xff]  ;;  %v51_v12 = vmul.f32 %v34_v8, %v34_v8  ;;  %v36_v14 = vld [vmem:[#allocation3 + $0x30] sm:$0xff]  ;;  %v37_v17 = vld [vmem:[#allocation3 + $0x38] sm:$0xff]  ;;  %s127_s16 = sshll.u32 %s220_s1, 4  ;;  %s128_s16 = int_to_ptr.hbm [resolvable:$true] %s127_s16 }
   0x9   :  { %v63_v10 = vadd.f32 %v48_v6, %v47_v5  ;;  %v52_v15 = vmul.f32 %v35_v11, %v35_v11  ;;  %v53_v18 = vmul.f32 %v36_v14, %v36_v14  ;;  %v38_v20 = vld [vmem:[#allocation3 + $0x40] sm:$0xff]  ;;  %v54_v21 = vmul.f32 %v37_v17, %v37_v17  ;;  %v39_v23 = vld [vmem:[#allocation3 + $0x48] sm:$0xff]  ;;  %v40_v26 = vld [vmem:[#allocation3 + $0x50] sm:$0xff] }
   0xa   :  { %v55_v24 = vmul.f32 %v38_v20, %v38_v20  ;;  %v56_v27 = vmul.f32 %v39_v23, %v39_v23  ;;  %v41_v29 = vld [vmem:[#allocation3 + $0x58] sm:$0xff]  ;;  %v57_v30 = vmul.f32 %v40_v26, %v40_v26  ;;  %v42_v32 = vld [vmem:[#allocation3 + $0x60] sm:$0xff]  ;;  %v43_v35 = vld [vmem:[#allocation3 + $0x68] sm:$0xff] }
   0xb   :  { %v64_v13 = vadd.f32 %v63_v10, %v49_v7  ;;  %v58_v33 = vmul.f32 %v41_v29, %v41_v29  ;;  %v59_v36 = vmul.f32 %v42_v32, %v42_v32  ;;  %v44_v38 = vld [vmem:[#allocation3 + $0x70] sm:$0xff]  ;;  %v60_v39 = vmul.f32 %v43_v35, %v43_v35  ;;  %v45_v41 = vld [vmem:[#allocation3 + $0x78] sm:$0xff] }
   0xc   :  { %v61_v42 = vmul.f32 %v44_v38, %v44_v38  ;;  %v62_v44 = vmul.f32 %v45_v41, %v45_v41 }
   0xd   :  { %v65_v16 = vadd.f32 %v64_v13, %v50_v9 }
   0xe   :  { %v46_v53 = vld [vmem:[#allocation2] sm:$0x1] }
   0xf   :  { %v66_v19 = vadd.f32 %v65_v16, %v51_v12 }
  0x11   :  { %v67_v22 = vadd.f32 %v66_v19, %v52_v15 }
  0x13   :  { %v68_v25 = vadd.f32 %v67_v22, %v53_v18 }
  0x15   :  { %v69_v28 = vadd.f32 %v68_v25, %v54_v21 }
  0x17   :  { %v70_v31 = vadd.f32 %v69_v28, %v55_v24 }
  0x19   :  { %v71_v34 = vadd.f32 %v70_v31, %v56_v27 }
  0x1b   :  { %v72_v37 = vadd.f32 %v71_v34, %v57_v30 }
  0x1d   :  { %v73_v40 = vadd.f32 %v72_v37, %v58_v33 }
  0x1f   :  { %v74_v43 = vadd.f32 %v73_v40, %v59_v36 }
  0x21   :  { %v75_v45 = vadd.f32 %v74_v43, %v60_v39 }
  0x23   :  { %v76_v46 = vadd.f32 %v75_v45, %v61_v42 }
  0x25   :  { %v77_v47 = vadd.f32 %v76_v46, %v62_v44 }
  0x27   :  { %v78_v48 = vrot.slane %v77_v47, 4 }
  0x29   :  { %v79_v49 = vadd.f32 %v78_v48, %v77_v47 }
  0x2b   :  { %v80_v50 = vrot.slane %v79_v49, 2 }
  0x2d   :  { %v81_v51 = vadd.f32 %v80_v50, %v79_v49 }
  0x2f   :  { %v82_v52 = vrot.slane %v81_v51, 1 }
  0x31   :  { %v83_v54 = vadd.f32 %v82_v52, %v81_v51 }
  0x33   :  { %v84_v55 = vadd.f32 %v83_v54, %v46_v53 }
  0x35   :  { %85 = vst [vmem:[#allocation2] sm:$0x1] %v84_v55 }
  0x3c   :  { %v89_v56 = vld [vmem:[#allocation2] sm:$0x1] }
  0x3d   :  { %142 = vrsqrt.f32 %v89_v56  ;;  %vm97_vm0 = vcmp.eq.f32.partialorder %v89_v56, inf  ;;  %v100_v0 = vand.u32 2147483648, %v89_v56  ;;  %vm99_vm1 = vcmp.eq.f32.partialorder %v89_v56, 0.0 }
  0x43   :  { %v143_v57 = vpop.eup %142 }
  0x44   :  { %v91_v58 = vmul.f32 %v143_v57, %v89_v56 }
  0x46   :  { %v92_v59 = vmul.f32 %v143_v57, %v91_v58 }
  0x48   :  { %v93_v60 = vmul.f32 0.5, %v92_v59 }
  0x4a   :  { %v94_v61 = vsub.f32 1.5, %v93_v60 }
  0x4c   :  { %v95_v62 = vmul.f32 %v143_v57, %v94_v61 }
  0x4e   :  { %v96_v63 = vmul.f32 %v95_v62, %v89_v56 }
  0x50   :  { %v98_v1 = vsel %vm97_vm0, %v89_v56, %v96_v63 }
  0x51   :  { %v101_v2 = vsel %vm99_vm1, %v100_v0, %v98_v1 }
  0x52   :  { %144 = vrcp.f32 %v101_v2  ;;  %v114_v6 = vand.u32 2147483648, %v101_v2  ;;  %v112_v8 = vand.u32 2147483647, %v101_v2  ;;  %vm108_vm3 = vweird.f32 %v101_v2 }
  0x53   :  { %vm102_vm6 = vcmp.gt.f32.partialorder %v101_v2, 0.0 }
  0x54   :  { %v115_v10 = vor.u32 1.1754944e-38, %v114_v6  ;;  %vm113_vm5 = vcmp.eq.f32.partialorder %v112_v8, 8.507059e+37 }
  0x58   :  { %v145_v3 = vpop.eup %144 }
  0x59   :  { %v104_v4 = vmul.f32 %v145_v3, %v101_v2  ;;  %vm109_vm2 = vweird.f32 %v145_v3 }
  0x5a   :  { %vm110_vm4 = vmor %vm108_vm3, %vm109_vm2 }
  0x5b   :  { %v105_v5 = vsub.f32 1.0, %v104_v4 }
  0x5d   :  { %v106_v7 = vmul.f32 %v145_v3, %v105_v5 }
  0x5f   :  { %v107_v9 = vadd.f32 %v145_v3, %v106_v7 }
  0x61   :  { %v111_v11 = vsel %vm110_vm4, %v145_v3, %v107_v9 }
  0x62   :  { %v116_v12 = vsel %vm113_vm5, %v115_v10, %v111_v11 }
  0x63   :  { %v118_v13 = vsel %vm102_vm6, %v116_v12, 0.0 }
  0x64   :  { %119 = vst [vmem:[#allocation6] sm:$0x1] %v118_v13 }
  0x65   :  { %130 = dma.vmem_to_hbm [thread:$0]  %s126_s13, 16, %s128_s16, [#allocation5]  }
  0x66   :  { %196 = dma.done.wait [#allocation5], 16  }
  0x67   :  { %197 = vsyncadd [#allocation5], 4294967280 }
  0x68   :  { %135 = vsyncpa [#allocation4], 1 }
  0x69   :  { %136 = vsyncpa [#allocation5], 1 }

</bundles_post_ra>
